<compile_context>
chip_gen: v6e
topology: v6e:2x2x1
jax: 0.10.0
libtpu: 0.0.40
codegen_flags: <defaults>
</compile_context>

<pallas_src>
import jax
import jax.numpy as jnp
from jax.experimental import pallas as pl
from jax.experimental.pallas import tpu as pltpu


# ----------------------------- Pallas kernel ---------------------------------
def _dq_linear_kernel(x_ref, w_ref, b_ref, o_ref):
    # x_ref: (tm, fold*K)        float32 (cast to compute dtype in-kernel)
    # w_ref: (fold*K, fold*N)    compute dtype (block-diag of `fold` copies of W)
    # b_ref: (1, fold*N)         float32
    # o_ref: (tm, fold*N)        output dtype (x.dtype)
    x = x_ref[...].astype(w_ref.dtype)                       # in-kernel bf16 cast
    acc = jnp.dot(x, w_ref[...], preferred_element_type=jnp.float32)
    o_ref[...] = (acc + b_ref[...]).astype(o_ref.dtype)      # f32 bias add, one cast


# ------------------------ Hamilton block construction --------------------------
def _quaternion_block(r, i, j, k):
    """(4*in_q, 4*out_q) Hamilton-product block matrix (same layout as the reference)."""
    return jnp.concatenate(
        [
            jnp.concatenate([r, -i, -j, -k], axis=0),
            jnp.concatenate([i, r, -k, j], axis=0),
            jnp.concatenate([j, k, r, -i], axis=0),
            jnp.concatenate([k, -j, i, r], axis=0),
        ],
        axis=1,
    )


def _dense_weight(r, i, j, k, r2, i2, j2, k2):
    """Full dual-quaternion weight W = [[Q1, Q2], [0, Q1]] of shape (in_feat, out_feat)."""
    q1 = _quaternion_block(r, i, j, k)
    q2 = _quaternion_block(r2, i2, j2, k2)
    zero = jnp.zeros_like(q1)
    top = jnp.concatenate([q1, q2], axis=1)
    bot = jnp.concatenate([zero, q1], axis=1)
    return jnp.concatenate([top, bot], axis=0)


def _round_up(v, m):
    return ((v + m - 1) // m) * m


# ------------------------------- wrapper --------------------------------------
def dual_quaternion_linear(x, r, i, j, k, r2, i2, j2, k2, bias=None,
                           compute_dtype=jnp.bfloat16, block_m=4096):
    """Equivalent of DualQuaternionLinear.forward (2-D or 3-D inputs)."""
    W = _dense_weight(r, i, j, k, r2, i2, j2, k2)            # (K, N), f32, tiny
    K, N = W.shape

    orig_shape = x.shape
    if x.ndim == 3:
        T, Nb, C = x.shape
        x2 = x.reshape(T * Nb, C)
    elif x.ndim == 2:
        x2 = x
    else:
        raise NotImplementedError
    M, Kx = x2.shape
    assert Kx == K, f"feature dim {Kx} != weight dim {K}"
    out_dtype = x.dtype

    # ---- lane-dense fold: present a 128-lane output so stores are unmasked -----
    fold = 128 // N if (N < 128 and 128 % N == 0) else 1
    M_f = _round_up(M, fold)
    if M_f != M:                                             # pads at most fold-1 rows
        x2 = jnp.pad(x2, ((0, M_f - M), (0, 0)))
    Mf = M_f // fold
    Kf, Nf = fold * K, fold * N

    xf = x2.reshape(Mf, Kf)                                  # free row-major view
    # block_diag(W, ..., W) with `fold` copies, cast to bf16 for the MXU (<=32 KiB).
    Wf = jnp.kron(jnp.eye(fold, dtype=W.dtype), W).astype(compute_dtype)
    if bias is None:
        bf = jnp.zeros((1, Nf), jnp.float32)
    else:
        bf = jnp.tile(bias.astype(jnp.float32).reshape(1, N), (1, fold))

    if Mf <= block_m:
        # Small case: single whole-array call, no grid bookkeeping.
        out = pl.pallas_call(
            _dq_linear_kernel,
            out_shape=jax.ShapeDtypeStruct((Mf, Nf), out_dtype),
        )(xf, Wf, bf)
    else:
        # Large-M case: tile rows; ragged last tile handled as a partial edge block
        # (no full-array padding).  Grid always has >= 2 steps so v7x's two
        # TensorCores both get work via the "parallel" axis.
        tm = min(block_m, _round_up(pl.cdiv(Mf, 2), 8))
        grid_m = pl.cdiv(Mf, tm)
        out = pl.pallas_call(
            _dq_linear_kernel,
            out_shape=jax.ShapeDtypeStruct((Mf, Nf), out_dtype),
            grid=(grid_m,),
            in_specs=[
                pl.BlockSpec((tm, Kf), lambda m: (m, 0)),
                pl.BlockSpec((Kf, Nf), lambda m: (0, 0)),
                pl.BlockSpec((1, Nf), lambda m: (0, 0)),
            ],
            out_specs=pl.BlockSpec((tm, Nf), lambda m: (m, 0)),
            compiler_params=pltpu.CompilerParams(
                dimension_semantics=("parallel",),
                vmem_limit_bytes=64 << 20,   # covers v5e's smaller scoped default
            ),
        )(xf, Wf, bf)

    out = out.reshape(M_f, N)
    if M_f != M:
        out = out[:M]                                        # at most fold-1 rows dropped
    if x.ndim == 3:
        out = out.reshape(orig_shape[0], orig_shape[1], N)
    return out


# --------------------------------- main ----------------------------------------
if __name__ == "__main__":
    # Module config: DualQuaternionLinear(in_features=64, out_features=64, bias=True)
    in_features, out_features = 64, 64
    in_q, out_q = in_features // 8, out_features // 8

    key = jax.random.PRNGKey(0)
    keys = jax.random.split(key, 12)

    # Deterministic synthetic init (he-like scale); quaternion_init / affect_init are
    # host-side parameter initialization, not part of the forward pass.
    scale = 1.0 / jnp.sqrt(2.0 * in_q)
    ws = [scale * jax.random.normal(keys[n], (in_q, out_q), jnp.float32) for n in range(8)]
    r, i, j, k, r2, i2, j2, k2 = ws
    # Non-zero bias to exercise the bias add (reset_parameters zero-fills it, but the
    # forward pass must be correct for any bias value).
    bias = 0.1 * jax.random.normal(keys[8], (out_features,), jnp.float32)

    W_ref = _dense_weight(r, i, j, k, r2, i2, j2, k2)

    def reference(x2, dtype, b=bias):
        y = jnp.dot(x2.astype(dtype), W_ref.astype(dtype),
                    preferred_element_type=jnp.float32)
        if b is not None:
            y = y + b.astype(jnp.float32)
        return y.astype(x2.dtype)

    # --- Test 1: 3-D input (T, N, C), small M -> single-call (no-grid) path -----
    T, Nb, C = 8, 2, in_features
    x3 = jax.random.normal(keys[9], (T, Nb, C), jnp.float32)
    out3 = jax.block_until_ready(
        dual_quaternion_linear(x3, r, i, j, k, r2, i2, j2, k2, bias))
    assert out3.shape == (T, Nb, out_features)
    ref3 = reference(x3.reshape(T * Nb, C), jnp.bfloat16).reshape(T, Nb, out_features)
    ref3_f32 = reference(x3.reshape(T * Nb, C), jnp.float32).reshape(T, Nb, out_features)
    assert jnp.allclose(out3, ref3, atol=2e-3, rtol=2e-3), "3-D mismatch vs bf16 reference"
    assert jnp.allclose(out3, ref3_f32, atol=5e-2, rtol=5e-2), "3-D mismatch vs f32 reference"

    # --- Test 2: 2-D input, forced tiled grid path with a partial last tile ------
    M2 = 300                                 # folded rows = 150 -> grid of 3 tm=64 tiles
    x2 = jax.random.normal(keys[10], (M2, in_features), jnp.float32)
    out2 = jax.block_until_ready(
        dual_quaternion_linear(x2, r, i, j, k, r2, i2, j2, k2, bias, block_m=64))
    assert out2.shape == (M2, out_features)
    assert jnp.allclose(out2, reference(x2, jnp.bfloat16),
                        atol=2e-3, rtol=2e-3), "2-D mismatch vs bf16 reference"

    # --- Test 3: odd row count (exercises the fold-alignment pad), no bias -------
    M3 = 13
    x2b = jax.random.normal(keys[11], (M3, in_features), jnp.float32)
    out3b = jax.block_until_ready(
        dual_quaternion_linear(x2b, r, i, j, k, r2, i2, j2, k2, None))
    assert out3b.shape == (M3, out_features)
    assert jnp.allclose(out3b, reference(x2b, jnp.bfloat16, b=None),
                        atol=2e-3, rtol=2e-3), "odd-M / no-bias mismatch"

    print("KERNEL_OK")
</pallas_src>

<mosaic_0001>
module attributes {stable_mosaic.version = 11 : i64} {
  func.func @_dq_linear_kernel(%arg0: memref<8x128xf32, #tpu.memory_space<vmem>>, %arg1: memref<128x128xbf16, #tpu.memory_space<vmem>>, %arg2: memref<1x128xf32, #tpu.memory_space<vmem>>, %arg3: memref<8x128xf32, #tpu.memory_space<vmem>>) attributes {dimension_semantics = [], scalar_prefetch = 0 : i64, scratch_operands = 0 : i64, tpu.core_type = #tpu.core_type<tc>} {
    %c0 = arith.constant 0 : index
    %c0_0 = arith.constant 0 : index
    %0 = vector.load %arg0[%c0, %c0_0] : memref<8x128xf32, #tpu.memory_space<vmem>>, vector<8x128xf32>
    %1 = arith.truncf %0 : vector<8x128xf32> to vector<8x128xbf16>
    %c0_1 = arith.constant 0 : index
    %c0_2 = arith.constant 0 : index
    %2 = vector.load %arg1[%c0_1, %c0_2] : memref<128x128xbf16, #tpu.memory_space<vmem>>, vector<128x128xbf16>
    %cst = arith.constant dense<0.000000e+00> : vector<8x128xf32>
    %3 = tpu.matmul %1, %2, %cst {dimension_numbers = #tpu.dot_dimension_numbers<[1], [0], [0], [1], [0, 0, 1, 1], [], []>} : vector<8x128xbf16>, vector<128x128xbf16>, vector<8x128xf32> -> vector<8x128xf32>
    %c0_3 = arith.constant 0 : index
    %c0_4 = arith.constant 0 : index
    %4 = vector.load %arg2[%c0_3, %c0_4] : memref<1x128xf32, #tpu.memory_space<vmem>>, vector<1x128xf32>
    %5 = vector.broadcast %4 : vector<1x128xf32> to vector<8x128xf32>
    %6 = arith.addf %3, %5 : vector<8x128xf32>
    %c0_5 = arith.constant 0 : index
    %c0_6 = arith.constant 0 : index
    %7 = vector.load %arg3[%c0_5, %c0_6] : memref<8x128xf32, #tpu.memory_space<vmem>>, vector<8x128xf32>
    tpu.vector_store %arg3[%c0_5, %c0_6], %6 {strides = array<i32>} : memref<8x128xf32, #tpu.memory_space<vmem>>, vector<8x128xf32>,
    return
  }
}

</mosaic_0001>

<bundles_post_ra>
// kernel: tpu_custom_call.1
= control target key start
LH: loop header
LB: loop body
LE: loop exit
PB: predicated region body
PF: predicated region fallthrough
CT: control target
= control target key end

     0   :  { %8 = vsyncpa [#allocation3], 0  ;;  %s330_s0 = inlined_call_operand.hbm [shape: f32[8,128], index: 0, kind: input, shape index: {}]   ;;  %s331_s1 = inlined_call_operand.hbm [shape: bf16[128,128], index: 1, kind: input, shape index: {}]   ;;  %s332_s2 = inlined_call_operand.vmem [shape: f32[1,128], index: 2, kind: input, shape index: {}]   ;;  %s333_s3 = inlined_call_operand.hbm [shape: f32[8,128], index: 3, kind: output, shape index: {}]  }
   0x1   :  { %9 = vsyncpa [#allocation6], 0 }
   0x2   :  { %10 = vsyncpa [#allocation4], 0  ;;  %s291_s12 = smov [#allocation2]   ;;  %s292_s14 = smov [#allocation5]  }
   0x3   :  { %s17_s13 = sshll.u32 %s291_s12, 4  ;;  %s26_s15 = sshll.u32 %s292_s14, 4  ;;  %s18_s13 = int_to_ptr.vmem [resolvable:$true] %s17_s13  ;;  %s27_s15 = int_to_ptr.vmem [resolvable:$true] %s26_s15 }
   0x4   :  { %s233_s16 = scalar_lea.vmem %s18_s13, 128  ;;  %p238_p1 = scmp.lt.s32.totalorder %s18_s13, %s18_s13 }
   0x5   :  { %p234_p0 = scmp.ne.s32.totalorder %s18_s13, %s233_s16  ;;  %p239_p2 = scmp.lt.s32.totalorder %s233_s16, %s233_s16 }
   0x7   :  { %p240_p3 = por %p239_p2, %p238_p1 }
   0x9   :  { %p241_p4 = pnand %p240_p3, %p234_p0 }
   0xb   :  { %244 = shalt.err (!%p241_p4)
}
   0xc   :  { %20 = dma.hbm_to_vmem [thread:$0]  %s330_s0, 128, %s18_s13, [#allocation3]  }
   0xd   :  { %s253_s19 = scalar_lea.vmem %s27_s15, 1024  ;;  %p258_p6 = scmp.lt.s32.totalorder %s27_s15, %s27_s15 }
   0xe   :  { %p254_p5 = scmp.ne.s32.totalorder %s27_s15, %s253_s19  ;;  %p259_p7 = scmp.lt.s32.totalorder %s253_s19, %s253_s19 }
  0x10   :  { %p260_p8 = por %p259_p7, %p258_p6 }
  0x12   :  { %p261_p9 = pnand %p260_p8, %p254_p5 }
  0x14   :  { %264 = shalt.err (!%p261_p9)
}
  0x15   :  { %s293_s20 = smov 64   ;;  %s294_s21 = smov 4  }
  0x16   :  { %32 = dma.hbm_to_vmem [thread:$0]  %s331_s1, 1024, %s27_s15, [#allocation6], %s293_s20, %s293_s20, %s294_s21  }
  0x17   :  { %285 = dma.done.wait [#allocation3], 128  }
  0x18   :  { %286 = vsyncadd [#allocation3], 4294967168 }
  0x19   :  { %287 = dma.done.wait [#allocation6], 1024  }
  0x1a   :  { %288 = vsyncadd [#allocation6], 4294966272  ;;  %v295_v0 = vmov 0.0   ;;  %vm296_vm0 = vmmov 0   ;;  %v217_v1 = vld [vmem:[#allocation5 + $0x38] sm:$0xff]   ;;  %v218_v2 = vld [vmem:[#allocation5 + $0x30] sm:$0xff]  }
  0x1b   :  { %190 = vmatprep.subr.bf16.mxu0 %v295_v0  ;;  %206 = vmatprep.mubr.msk.bf16.mxu0 %vm296_vm0, %v295_v0  ;;  %v219_v3 = vld [vmem:[#allocation5 + $0x28] sm:$0xff]   ;;  %v220_v4 = vld [vmem:[#allocation5 + $0x20] sm:$0xff]   ;;  %v221_v5 = vld [vmem:[#allocation5 + $0x18] sm:$0xff]   ;;  %s297_s24 = smov [#allocation7]  }
  0x1c   :  { %191 = vmatpush3.bf16.msra.mxu0 %v217_v1  ;;  %v222_v6 = vld [vmem:[#allocation5 + $0x10] sm:$0xff]   ;;  %v223_v7 = vld [vmem:[#allocation5 + $0x8] sm:$0xff]   ;;  %v224_v8 = vld [vmem:[#allocation5] sm:$0xff]   ;;  %s162_s25 = sshll.u32 %s297_s24, 4  ;;  %s163_s25 = int_to_ptr.vmem [resolvable:$true] %s162_s25 }
  0x1d   :  { %192 = vmatprep.subr.bf16.mxu0 %v295_v0  ;;  %v42_v9 = vld [vmem:[#allocation2] sm:$0xff]  ;;  %s265_s26 = scalar_lea.vmem %s163_s25, 128  ;;  %p270_p11 = scmp.lt.s32.totalorder %s163_s25, %s163_s25 }
  0x1e   :  { %v43_v10 = vpack.c.bf16 %v42_v9, %v42_v9  ;;  %v172_v11 = vld [vmem:[%s332_s2] ss:$0 sm:$0xff]  ;;  %p266_p10 = scmp.ne.s32.totalorder %s163_s25, %s265_s26  ;;  %p271_p12 = scmp.lt.s32.totalorder %s265_s26, %s265_s26 }
  0x20   :  { %193 = vmatpush3.bf16.msra.mxu0 %v218_v2  ;;  %p272_p13 = por %p271_p12, %p270_p11 }
  0x21   :  { %194 = vmatprep.subr.bf16.mxu0 %v295_v0 }
  0x22   :  { %p273_p0 = pnand %p272_p13, %p266_p10 }
  0x24   :  { %195 = vmatpush3.bf16.msra.mxu0 %v219_v3 }
  0x25   :  { %196 = vmatprep.subr.bf16.mxu0 %v295_v0 }
  0x28   :  { %197 = vmatpush3.bf16.msra.mxu0 %v220_v4 }
  0x29   :  { %198 = vmatprep.subr.bf16.mxu0 %v295_v0 }
  0x2c   :  { %199 = vmatpush3.bf16.msra.mxu0 %v221_v5 }
  0x2d   :  { %200 = vmatprep.subr.bf16.mxu0 %v295_v0 }
  0x30   :  { %201 = vmatpush3.bf16.msra.mxu0 %v222_v6 }
  0x31   :  { %202 = vmatprep.subr.bf16.mxu0 %v295_v0 }
  0x34   :  { %203 = vmatpush3.bf16.msra.mxu0 %v223_v7 }
  0x35   :  { %204 = vmatprep.subr.bf16.mxu0 %v295_v0 }
  0x38   :  { %205 = vmatpush3.bf16.msra.mxu0 %v224_v8 }
  0x3b   :  { %207 = vmatmul.mubr.bf16.vlgmr.msra.gmra.mxu0 %v43_v10 }
  0xfb   :  { %v149_v12 = vpop.f32.mrf.mxu0 }
  0xfc   :  { %v150_v13 = vadd.f32 %v172_v11, %v149_v12 }
  0xfd   :  { %v208_v14 = vpop.f32.mrf.mxu0 }
  0xfe   :  { %155 = vst [vmem:[#allocation7] sm:$0xff] %v150_v13 }
  0xff   :  { %v152_v15 = vpop.f32.mrf.mxu0 }
 0x100   :  { %276 = shalt.err (!%p273_p0)
}
 0x101   :  { %165 = dma.vmem_to_hbm [thread:$0]  %s163_s25, 128, %s333_s3, [#allocation4]   ;;  %v209_v16 = vpop.f32.mrf.mxu0 }
 0x102   :  { %289 = dma.done.wait [#allocation4], 128  }
 0x103   :  { %290 = vsyncadd [#allocation4], 4294967168 }
 0x104   :  { %169 = vsyncpa [#allocation3], 1 }
 0x105   :  { %170 = vsyncpa [#allocation6], 1 }
 0x106   :  { %171 = vsyncpa [#allocation4], 1 }

</bundles_post_ra>
